<compile_context>
chip_gen: v7x
topology: tpu7x:2x2x1
jax: 0.10.0
libtpu: 0.0.40
codegen_flags: <defaults>
</compile_context>

<pallas_src>
import functools

import jax
import jax.numpy as jnp
from jax.experimental import pallas as pl
from jax.experimental.pallas import tpu as pltpu


_BLOCK_BYTES = 2 * 1024 * 1024  # per-block budget; ~8 MiB with double-buffered in+out


def _gbn_kernel(x_ref, gamma_ref, beta_ref, o_ref, *, eps, n_per_group, group_spans_d2):
    """x_ref/o_ref: (d1, d2, d3).  gamma_ref/beta_ref: (d1, d2, 1) or (d1, 1, 1).

    group_spans_d2=True  -> one group per d1 row, stats over (d2, d3)  [C % G == 0]
    group_spans_d2=False -> one group per (d1, d2), stats over d3      [G % C == 0]
    """
    x = x_ref[...].astype(jnp.float32)
    inv_n = jnp.float32(1.0 / n_per_group)
    inv_nm1 = jnp.float32(1.0 / (n_per_group - 1))  # torch.std default: unbiased

    if group_spans_d2:
        mean = jnp.sum(jnp.sum(x, axis=2, keepdims=True), axis=1, keepdims=True) * inv_n
    else:
        mean = jnp.sum(x, axis=2, keepdims=True) * inv_n

    diff = x - mean
    sq = diff * diff
    if group_spans_d2:
        var = jnp.sum(jnp.sum(sq, axis=2, keepdims=True), axis=1, keepdims=True) * inv_nm1
    else:
        var = jnp.sum(sq, axis=2, keepdims=True) * inv_nm1

    std = jnp.sqrt(var)
    # One reciprocal per group (tiny column) instead of a full-tile divide.
    inv = pl.reciprocal(std + jnp.float32(eps), approx=False)

    gamma = gamma_ref[...].astype(jnp.float32)
    beta = beta_ref[...].astype(jnp.float32)
    scale = gamma * inv                       # per-(row[, sub-row]) column
    o_ref[...] = (diff * scale + beta).astype(o_ref.dtype)


def _largest_divisor_leq(n, cap):
    cap = max(1, min(n, cap))
    for d in range(cap, 0, -1):
        if n % d == 0:
            return d
    return 1


def group_batchnorm2d(x, gamma, beta, group_num=32, eps=1e-10):
    """x: (N, C, H, W); gamma, beta: (C, 1, 1). Returns (N, C, H, W)."""
    N, C, H, W = x.shape
    G = group_num
    HW = H * W
    total = C * HW
    assert total % G == 0, "C*H*W must be divisible by group_num"
    L = total // G
    assert L > 1, "need more than one element per group for unbiased std"

    if C % G == 0:
        # Each group = C//G whole channels; view (N, G, C//G, H*W). Minor dim H*W
        # keeps loads/stores lane dense.
        cpg = C // G
        rows, d2, d3 = G, cpg, HW
        x_v = x.reshape(N, rows, d2, d3)
        gamma_v = gamma.reshape(rows, d2, 1)
        beta_v = beta.reshape(rows, d2, 1)
        group_spans_d2 = True
    elif G % C == 0:
        # Each channel = G//C whole groups; view (N, C, G//C, H*W/(G//C)).
        gpc = G // C
        rows, d2, d3 = C, gpc, HW // gpc
        x_v = x.reshape(N, rows, d2, d3)
        gamma_v = gamma.reshape(rows, 1, 1)
        beta_v = beta.reshape(rows, 1, 1)
        group_spans_d2 = False
    else:
        # TODO(synk): groups straddling channel boundaries (neither C % G == 0 nor
        # G % C == 0) are not handled by this tiled layout.
        raise NotImplementedError(
            "GroupBatchnorm2d Pallas kernel requires C % G == 0 or G % C == 0")

    # Tile the row axis so each block stays small; groups never straddle blocks,
    # so every grid step is fully independent ("parallel", "parallel").
    itemsize = max(jnp.dtype(x.dtype).itemsize, 4)
    row_bytes = d2 * d3 * itemsize
    r_tile = _largest_divisor_leq(rows, max(1, _BLOCK_BYTES // row_bytes))
    grid = (N, rows // r_tile)
    g_d2 = gamma_v.shape[1]

    kernel = functools.partial(
        _gbn_kernel, eps=eps, n_per_group=L, group_spans_d2=group_spans_d2)

    out = pl.pallas_call(
        kernel,
        out_shape=jax.ShapeDtypeStruct((N, rows, d2, d3), x.dtype),
        grid_spec=pltpu.PrefetchScalarGridSpec(
            num_scalar_prefetch=0,
            grid=grid,
            in_specs=[
                pl.BlockSpec((pl.Squeezed(), r_tile, d2, d3),
                             lambda n, t: (n, t, 0, 0)),
                pl.BlockSpec((r_tile, g_d2, 1), lambda n, t: (t, 0, 0)),
                pl.BlockSpec((r_tile, g_d2, 1), lambda n, t: (t, 0, 0)),
            ],
            out_specs=pl.BlockSpec((pl.Squeezed(), r_tile, d2, d3),
                                   lambda n, t: (n, t, 0, 0)),
        ),
        compiler_params=pltpu.CompilerParams(
            dimension_semantics=("parallel", "parallel")),
    )(x_v, gamma_v, beta_v)

    return out.reshape(N, C, H, W)


def _reference(x, gamma, beta, group_num=32, eps=1e-10):
    N, C, H, W = x.shape
    xg = x.reshape(N, group_num, -1).astype(jnp.float32)
    mean = jnp.mean(xg, axis=2, keepdims=True)
    L = xg.shape[-1]
    var = jnp.sum((xg - mean) ** 2, axis=2, keepdims=True) / (L - 1)
    std = jnp.sqrt(var)
    xn = (xg - mean) / (std + eps)
    xn = xn.reshape(N, C, H, W)
    return xn * gamma.reshape(1, C, 1, 1) + beta.reshape(1, C, 1, 1)


if __name__ == "__main__":
    key = jax.random.PRNGKey(0)

    # Config matching the module defaults (G % C == 0 path): C*H*W = 1024, G = 32.
    N, C, H, W = 2, 4, 16, 16
    group_num = 32
    eps = 1e-10

    x = jax.random.normal(key, (N, C, H, W), dtype=jnp.float32)
    gamma = jnp.ones((C, 1, 1), dtype=jnp.float32)  # nn.Parameter(torch.ones(c,1,1))
    beta = jnp.zeros((C, 1, 1), dtype=jnp.float32)  # nn.Parameter(torch.zeros(c,1,1))

    out = group_batchnorm2d(x, gamma, beta, group_num=group_num, eps=eps)
    out = jax.block_until_ready(out)
    ref = _reference(x, gamma, beta, group_num=group_num, eps=eps)
    assert out.shape == (N, C, H, W)
    assert jnp.allclose(out, ref, atol=1e-5, rtol=1e-5)

    # Also exercise the common C % G == 0 path with non-trivial gamma/beta.
    k1, k2, k3 = jax.random.split(jax.random.PRNGKey(1), 3)
    N2, C2, H2, W2, G2 = 2, 64, 8, 8, 32
    x2 = jax.random.normal(k1, (N2, C2, H2, W2), dtype=jnp.float32)
    gamma2 = jax.random.normal(k2, (C2, 1, 1), dtype=jnp.float32)
    beta2 = jax.random.normal(k3, (C2, 1, 1), dtype=jnp.float32)
    out2 = jax.block_until_ready(
        group_batchnorm2d(x2, gamma2, beta2, group_num=G2, eps=eps))
    ref2 = _reference(x2, gamma2, beta2, group_num=G2, eps=eps)
    assert jnp.allclose(out2, ref2, atol=1e-5, rtol=1e-5)

    print("KERNEL_OK")
</pallas_src>

<mosaic_0001>
module attributes {stable_mosaic.version = 11 : i64} {
  func.func @_gbn_kernel(%arg0: i32, %arg1: i32, %arg2: memref<1x4x8x32xf32, #tpu.memory_space<vmem>>, %arg3: memref<4x1x1xf32, #tpu.memory_space<vmem>>, %arg4: memref<4x1x1xf32, #tpu.memory_space<vmem>>, %arg5: memref<1x4x8x32xf32, #tpu.memory_space<vmem>>) attributes {dimension_semantics = [#tpu.dimension_semantics<parallel>, #tpu.dimension_semantics<parallel>], iteration_bounds = array<i64: 2, 1>, scalar_prefetch = 0 : i64, scratch_operands = 0 : i64, tpu.core_type = #tpu.core_type<tc>, window_params = [{transform_indices = @transform_0, window_bounds = array<i64: 1, 4, 8, 32>}, {transform_indices = @transform_1, window_bounds = array<i64: 4, 1, 1>}, {transform_indices = @transform_2, window_bounds = array<i64: 4, 1, 1>}, {transform_indices = @transform_3, window_bounds = array<i64: 1, 4, 8, 32>}]} {
    %c0 = arith.constant 0 : index
    %c0_0 = arith.constant 0 : index
    %c0_1 = arith.constant 0 : index
    %c0_2 = arith.constant 0 : index
    %0 = vector.load %arg2[%c0, %c0_0, %c0_1, %c0_2] : memref<1x4x8x32xf32, #tpu.memory_space<vmem>>, vector<1x4x8x32xf32>
    %1 = vector.shape_cast %0 : vector<1x4x8x32xf32> to vector<4x8x32xf32>
    %cst = arith.constant dense<0.000000e+00> : vector<4x8xf32>
    %2 = vector.multi_reduction <add>, %1, %cst [2] : vector<4x8x32xf32> to vector<4x8xf32>
    %3 = vector.shape_cast %2 : vector<4x8xf32> to vector<4x8x1xf32>
    %cst_3 = arith.constant 3.125000e-02 : f32
    %4 = vector.broadcast %cst_3 : f32 to vector<4x8x1xf32>
    %5 = arith.mulf %3, %4 : vector<4x8x1xf32>
    %6 = vector.broadcast %5 : vector<4x8x1xf32> to vector<4x8x32xf32>
    %7 = arith.subf %1, %6 : vector<4x8x32xf32>
    %8 = arith.mulf %7, %7 : vector<4x8x32xf32>
    %cst_4 = arith.constant dense<0.000000e+00> : vector<4x8xf32>
    %9 = vector.multi_reduction <add>, %8, %cst_4 [2] : vector<4x8x32xf32> to vector<4x8xf32>
    %10 = vector.shape_cast %9 : vector<4x8xf32> to vector<4x8x1xf32>
    %cst_5 = arith.constant 0.0322580636 : f32
    %11 = vector.broadcast %cst_5 : f32 to vector<4x8x1xf32>
    %12 = arith.mulf %10, %11 : vector<4x8x1xf32>
    %13 = math.sqrt %12 : vector<4x8x1xf32>
    %cst_6 = arith.constant 1.000000e-10 : f32
    %14 = vector.broadcast %cst_6 : f32 to vector<4x8x1xf32>
    %15 = arith.addf %13, %14 : vector<4x8x1xf32>
    %16 = tpu.reciprocal %15 : vector<4x8x1xf32> -> vector<4x8x1xf32>
    %c0_7 = arith.constant 0 : index
    %c0_8 = arith.constant 0 : index
    %c0_9 = arith.constant 0 : index
    %17 = vector.load %arg3[%c0_7, %c0_8, %c0_9] : memref<4x1x1xf32, #tpu.memory_space<vmem>>, vector<4x1x1xf32>
    %c0_10 = arith.constant 0 : index
    %c0_11 = arith.constant 0 : index
    %c0_12 = arith.constant 0 : index
    %18 = vector.load %arg4[%c0_10, %c0_11, %c0_12] : memref<4x1x1xf32, #tpu.memory_space<vmem>>, vector<4x1x1xf32>
    %19 = vector.broadcast %17 : vector<4x1x1xf32> to vector<4x8x1xf32>
    %20 = arith.mulf %19, %16 : vector<4x8x1xf32>
    %21 = vector.broadcast %20 : vector<4x8x1xf32> to vector<4x8x32xf32>
    %22 = arith.mulf %7, %21 : vector<4x8x32xf32>
    %23 = vector.broadcast %18 : vector<4x1x1xf32> to vector<4x8x32xf32>
    %24 = arith.addf %22, %23 : vector<4x8x32xf32>
    %c0_13 = arith.constant 0 : index
    %c0_14 = arith.constant 0 : index
    %c0_15 = arith.constant 0 : index
    %c0_16 = arith.constant 0 : index
    %25 = vector.load %arg5[%c0_13, %c0_14, %c0_15, %c0_16] : memref<1x4x8x32xf32, #tpu.memory_space<vmem>>, vector<1x4x8x32xf32>
    %26 = vector.shape_cast %25 : vector<1x4x8x32xf32> to vector<4x8x32xf32>
    %27 = vector.shape_cast %24 : vector<4x8x32xf32> to vector<1x4x8x32xf32>
    tpu.vector_store %arg5[%c0_13, %c0_14, %c0_15, %c0_16], %27 {strides = array<i32>} : memref<1x4x8x32xf32, #tpu.memory_space<vmem>>, vector<1x4x8x32xf32>,
    return
  }
  func.func @transform_0(%arg0: i32, %arg1: i32) -> (i32, i32, i32, i32) {
    %c0_i32 = arith.constant 0 : i32
    %c0_i32_0 = arith.constant 0 : i32
    %c0_i32_1 = arith.constant 0 : i32
    return %arg0, %arg1, %c0_i32, %c0_i32_0 : i32, i32, i32, i32
  }
  func.func @transform_1(%arg0: i32, %arg1: i32) -> (i32, i32, i32) {
    %c0_i32 = arith.constant 0 : i32
    %c0_i32_0 = arith.constant 0 : i32
    %c0_i32_1 = arith.constant 0 : i32
    return %arg1, %c0_i32, %c0_i32_0 : i32, i32, i32
  }
  func.func @transform_2(%arg0: i32, %arg1: i32) -> (i32, i32, i32) {
    %c0_i32 = arith.constant 0 : i32
    %c0_i32_0 = arith.constant 0 : i32
    %c0_i32_1 = arith.constant 0 : i32
    return %arg1, %c0_i32, %c0_i32_0 : i32, i32, i32
  }
  func.func @transform_3(%arg0: i32, %arg1: i32) -> (i32, i32, i32, i32) {
    %c0_i32 = arith.constant 0 : i32
    %c0_i32_0 = arith.constant 0 : i32
    %c0_i32_1 = arith.constant 0 : i32
    return %arg0, %arg1, %c0_i32, %c0_i32_0 : i32, i32, i32, i32
  }
}

</mosaic_0001>

<bundles_post_ra>
// kernel: tpu_custom_call.1
= control target key start
LH: loop header
LB: loop body
LE: loop exit
PB: predicated region body
PF: predicated region fallthrough
CT: control target
= control target key end

     0   :  { %8 = vsyncpa [#allocation3], 0  ;;  %s1047_s0 = inlined_call_operand.hbm [shape: f32[2,4,8,32], index: 0, kind: input, shape index: {}]   ;;  %s1048_s1 = inlined_call_operand.vmem [shape: f32[4,1,1], index: 1, kind: input, shape index: {}]   ;;  %s1049_s2 = inlined_call_operand.vmem [shape: f32[4,1,1], index: 2, kind: input, shape index: {}]   ;;  %s1050_s3 = inlined_call_operand.hbm [shape: f32[2,4,8,32], index: 3, kind: output, shape index: {}]  }
   0x1   :  { %10 = vsyncpa [#allocation3 + $0x1], 0 }
   0x2   :  { %11 = vsyncpa [#allocation4], 0 }
   0x3   :  { %13 = vsyncpa [#allocation4 + $0x1], 0  ;;  %s812_s12 = smov 0   ;;  %s814_s13 = smov 0  }
   0x4   :  { %s816_s14 = smov 0   ;;  %s818_s15 = smov 0  }
   0x5   :  { %s820_s16 = smov 0   ;;  %s822_s17 = smov 0  }
   0x6 LB: > { %s559_s18 = sadd.s32 4294967295, %s783_s17   ;;  %s560_s19 = sadd.s32 4294967294, %s783_s17   ;;  %s783_s17 = sphi %s822_s17, %s19_s17   ;;  %s779_s16 = sphi %s820_s16, %s1065_s16   ;;  %s775_s15 = sphi %s818_s15, %s1064_s15   ;;  %s771_s14 = sphi %s816_s14, %s1063_s14   ;;  %s767_s13 = sphi %s814_s13, %s1062_s13   ;;  %s763_s12 = sphi %s812_s12, %s1061_s12  }
   0x7   : > { %s31_s20 = sadd.s32 1, %s779_s16  ;;  %s40_s21 = sadd.s32 1, %s771_s14 }
   0x8   : > { %p33_p0 = scmp.ge.s32.totalorder %s31_s20, 2  ;;  %p47_p1 = scmp.ne.s32.totalorder %s771_s14, %s767_s13 }
   0x9   : > { %p48_p2 = scmp.eq.s32.totalorder %s783_s17, 0  ;;  %p53_p3 = scmp.ne.s32.totalorder %s767_s13, %s763_s12 }
   0xa   : > { %s1067_s20 = smov (%p33_p0, %s31_s20), 0  ;;  %p54_p5 = scmp.eq.s32.totalorder %s559_s18, 0 }
   0xb   : > { %p853_p4 = por %p48_p2, %p47_p1  ;;  %s35_s23 = ssub.s32 %s779_s16, %s1067_s20 }
   0xc   : > { %p131_p6 = scmp.eq.s32.totalorder %s559_s18, 1  ;;  %p38_p7 = scmp.eq.s32.totalorder %s35_s23, 0 }
   0xd   : > { %p859_p8 = por %p54_p5, %p53_p3  ;;  %p137_p10 = scmp.eq.s32.totalorder %s560_s19, 1 }
   0xe   : > { %p863_p9 = por %p131_p6, %p47_p1  ;;  %p598_p13 = scmp.lt.s32.totalorder %s783_s17, 2 }
   0xf   : > { %s868_s26 = scalar_select %p38_p7, %s771_s14, %s40_s21  }
  0x10   : > { %s1054_s25 = scalar_select %p863_p9, 1, 0 }
  0x11   : > { %p870_p11 = por %p137_p10, %p53_p3  ;;  %s173_s28 = sand.u32 1, %s771_s14  }
  0x12   : > { %s565_s29 = sshll.u32 %s173_s28, 5  ;;  %s584_s30 = sshll.u32 %s779_s16, 9 }
  0x13   : > { %s1055_s27 = scalar_select %p870_p11, 1, 0 }
  0x14   : > { %s881_s6 = scalar_lea.hbm %s1047_s0, %s584_s30  ;;  %s177_s7 = scalar_lea.vmem [#allocation2], %s565_s29 }
  0x15   : > { %s186_s8 = sshll.u32 %s177_s7, 4  ;;  %p887_p0 = pnand %p598_p13, %p853_p4  ;;  %s883_s8 = int_to_ptr.vmem [resolvable:$true] %s186_s8 }
  0x16   : > { %s892_s10 = scalar_lea.sflag [#allocation3], %s173_s28  ;;  %s671_s11 = scalar_lea.hbm %s881_s6, 512 }
  0x17   : > { %p672_p2 = scmp.ne.s32.totalorder %s881_s6, %s671_s11  ;;  %p673_p3 = pneg %p887_p0 }
  0x18   : > { %s676_s21 = scalar_lea.hbm %s1047_s0, 1024  ;;  %p677_p4 = scmp.lt.u32.totalorder %s881_s6, %s1047_s0 }
  0x19   : > { %p674_p5 = pnand %p673_p3, %p672_p2  ;;  %p678_p7 = scmp.lt.u32.totalorder %s676_s21, %s671_s11 }
  0x1a   : > { %p680_p13 = scmp.lt.u32.totalorder %s671_s11, %s881_s6 }
  0x1b   : > { %p675_p6 = pneg %p674_p5  ;;  %p679_p10 = por %p678_p7, %p677_p4 }
  0x1d   : > { %p681_p12 = por %p680_p13, %p679_p10 }
  0x1f   : > { %p682_p1 = pnand %p681_p12, %p675_p6 }
  0x21   : > { %685 = shalt.err (!%p682_p1)
}
  0x22   : > { %s686_s28 = scalar_lea.vmem %s883_s8, 512  ;;  %s785_s29 = smov [#allocation2]  }
  0x23   : > { %p687_p2 = scmp.ne.s32.totalorder %s883_s8, %s686_s28  ;;  %s691_s30 = sshll.u32 %s785_s29, 4  ;;  %s692_s30 = int_to_ptr.vmem [resolvable:$false] %s691_s30 }
  0x24   : > { %s693_s4 = scalar_lea.vmem %s692_s30, 1024  ;;  %p694_p9 = scmp.lt.s32.totalorder %s883_s8, %s692_s30 }
  0x25   : > { %p689_p5 = pnand %p687_p2, %p673_p3  ;;  %p695_p4 = scmp.lt.s32.totalorder %s693_s4, %s686_s28 }
  0x27   : > { %p690_p11 = pneg %p689_p5  ;;  %p696_p7 = por %p695_p4, %p694_p9 }
  0x29   : > { %p697_p10 = pnand %p696_p7, %p690_p11 }
  0x2b   : > { %700 = shalt.err (!%p697_p10)
}
  0x2c   : > { %s786_s5 = smov 128   ;;  %s787_s7 = smov 8  }
  0x2d   : > { %593 = dma.hbm_to_vmem [thread:$0]  (!%p887_p0), %s881_s6, 512, %s883_s8, %s892_s10, %s786_s5, %s786_s5, %s787_s7  }
  0x2e   : > { %p194_p12 = scmp.lt.s32.totalorder %s783_s17, 3  ;;  %p1057_p1 = scmp.ge.s32.totalorder %s783_s17, 1 }
  0x30   : > { %p195_p3 = pnand %p1057_p1, %p194_p12 }
  0x31   : > { %s924_s11 = sand.u32 (!%p195_p3), 1, %s767_s13  }
  0x32   : > { %198 = sbr.rel (%p195_p3) target bundleno = 544 (0x220), region = 32  ;;  %s569_s18 = sshll.u32 (!%p195_p3), %s924_s11, 5 }
  0x33   : > { %s201_s19 = scalar_lea.sflag (!%p195_p3), [#allocation3], %s924_s11  ;;  %s204_s21 = scalar_lea.vmem (!%p195_p3), [#allocation2], %s569_s18 }
  0x39   : > { %754 = dma.done.wait (%p859_p8), %s201_s19, 512  }
  0x3a   : > { %756 = vsyncadd (%p859_p8), %s201_s19, 4294966784  ;;  %vm251_vm0 = vcmask 261120   ;;  %v247_v0 = vld [vmem:[%s204_s21] sm:$0xff]  ;;  %v249_v1 = vld [vmem:[%s204_s21 + $0x10] sm:$0xff]  ;;  %v788_v28 = vmov 0   ;;  %s234_s6 = scalar_lea.vmem [#allocation5], %s569_s18 }
  0x3b   : > { %v248_v2 = vld [vmem:[%s204_s21 + $0x8] sm:$0xff]  ;;  %v252_v3 = vsel %vm251_vm0, %v247_v0, 0.0  ;;  %v258_v4 = vsel %vm251_vm0, %v249_v1, 0.0  ;;  %v250_v5 = vld [vmem:[%s204_s21 + $0x18] sm:$0xff]  ;;  %654 = vset.pattern.permute.xlu1 %v788_v28  ;;  %v575_v29 = vld [vmem:[%s1049_s2] ss:$0 sm:$0xff]  ;;  %653 = vset.pattern.permute.xlu0 %v788_v28 }
  0x3c   : > { %253 = vadd.xlane.f32.xlu0 %v252_v3  ;;  %259 = vadd.xlane.f32.xlu1 %v258_v4  ;;  %v255_v6 = vsel %vm251_vm0, %v248_v2, 0.0  ;;  %v261_v7 = vsel %vm251_vm0, %v250_v5, 0.0  ;;  %v576_v30 = vld [vmem:[%s1049_s2 + $0x1] ss:$0 sm:$0xff]  ;;  %v577_v31 = vld [vmem:[%s1049_s2 + $0x2] ss:$0 sm:$0xff] }
  0x3d   : > { %v572_v3 = vld [vmem:[%s1048_s1 + $0x1] ss:$0 sm:$0xff]  ;;  %s448_s8 = sshll.u32 %s234_s6, 4  ;;  %s585_s9 = sshll.u32 %s775_s15, 9  ;;  %s991_s8 = int_to_ptr.vmem [resolvable:$true] %s448_s8 }
  0x3e   : > { %s997_s22 = scalar_lea.hbm %s1050_s3, %s585_s9  ;;  %s433_s23 = scalar_lea.sflag [#allocation4], %s924_s11 }
  0x3f   : > { %s701_s28 = scalar_lea.vmem %s991_s8, 512  ;;  %p1058_p9 = scmp.ne.s32.totalorder %s1054_s25, 0 }
  0x40   : > { %256 = vadd.xlane.f32.xlu0 %v255_v6  ;;  %262 = vadd.xlane.f32.xlu1 %v261_v7  ;;  %v573_v7 = vld [vmem:[%s1048_s1 + $0x2] ss:$0 sm:$0xff]  ;;  %p702_p8 = scmp.ne.s32.totalorder %s991_s8, %s701_s28  ;;  %s789_s15 = smov [#allocation5]  }
  0x41   : > { %s705_s29 = sshll.u32 %s789_s15, 4  ;;  %s706_s29 = int_to_ptr.vmem [resolvable:$false] %s705_s29 }
  0x42   : > { %p703_p11 = pnand %p702_p8, %p1058_p9  ;;  %s707_s30 = scalar_lea.vmem %s706_s29, 1024 }
  0x43   : > { %p708_p6 = scmp.lt.s32.totalorder %s991_s8, %s706_s29  ;;  %p709_p13 = scmp.lt.s32.totalorder %s707_s30, %s701_s28 }
  0x44   : > { %p704_p0 = pneg %p703_p11 }
  0x45   : > { %p710_p2 = por %p709_p13, %p708_p6 }
  0x47   : > { %p711_p5 = pnand %p710_p2, %p704_p0 }
  0xc9   : > { %v254_v8 = vpop.xlane.xlu0 %253  ;;  %v260_v9 = vpop.xlane.xlu1 %259 }
  0xca   : > { %v264_v10 = vmul.f32 0.03125, %v254_v8  ;;  %v266_v11 = vmul.f32 0.03125, %v260_v9 }
  0xcc   : > { %v938_v12 = vsub.f32 %v247_v0, %v264_v10  ;;  %v940_v13 = vsub.f32 %v249_v1, %v266_v11  ;;  %v571_v0 = vld [vmem:[%s1048_s1] ss:$0 sm:$0xff]  ;;  %v574_v10 = vld [vmem:[%s1048_s1 + $0x3] ss:$0 sm:$0xff] }
  0xcd   : > { %v257_v14 = vpop.xlane.xlu0 %256  ;;  %v263_v15 = vpop.xlane.xlu1 %262 }
  0xce   : > { %v265_v16 = vmul.f32 0.03125, %v257_v14  ;;  %v267_v17 = vmul.f32 0.03125, %v263_v15  ;;  %v272_v18 = vmul.f32 %v938_v12, %v938_v12  ;;  %v274_v19 = vmul.f32 %v940_v13, %v940_v13  ;;  %v578_v14 = vld [vmem:[%s1049_s2 + $0x3] ss:$0 sm:$0xff] }
  0xd0   : > { %v946_v20 = vsub.f32 %v248_v2, %v265_v16  ;;  %v948_v21 = vsub.f32 %v250_v5, %v267_v17  ;;  %v276_v22 = vsel %vm251_vm0, %v272_v18, 0.0  ;;  %v282_v23 = vsel %vm251_vm0, %v274_v19, 0.0 }
  0xd1   : > { %277 = vadd.xlane.f32.xlu0 %v276_v22 }
  0xd2   : > { %v273_v24 = vmul.f32 %v946_v20, %v946_v20  ;;  %v275_v25 = vmul.f32 %v948_v21, %v948_v21 }
  0xd4   : > { %v279_v26 = vsel %vm251_vm0, %v273_v24, 0.0  ;;  %v285_v27 = vsel %vm251_vm0, %v275_v25, 0.0 }
  0xd5   : > { %283 = vadd.xlane.f32.xlu0 %v282_v23  ;;  %280 = vadd.xlane.f32.xlu1 %v279_v26 }
  0xd9   : > { %286 = vadd.xlane.f32.xlu1 %v285_v27 }
  0xea   : > { %409 = vperm.xlu1 %654, %v575_v29  }
  0xee   : > { %413 = vperm.xlu1 %654, %v576_v30  }
  0xf2   : > { %417 = vperm.xlu1 %654, %v577_v31  }
 0x15e   : > { %v278_v32 = vpop.xlane.xlu0 %277 }
 0x15f   : > { %v288_v33 = vmul.f32 0.032258064, %v278_v32 }
 0x161   : > { %655 = vrsqrt.f32 %v288_v33  ;;  %vm294_vm1 = vcmp.eq.f32.partialorder %v288_v33, inf  ;;  %v297_v42 = vand.u32 2147483648, %v288_v33  ;;  %vm296_vm2 = vcmp.eq.f32.partialorder %v288_v33, 0.0 }
 0x162   : > { %v281_v34 = vpop.xlane.xlu1 %280  ;;  %v284_v35 = vpop.xlane.xlu0 %283 }
 0x163   : > { %v289_v36 = vmul.f32 0.032258064, %v281_v34  ;;  %v290_v37 = vmul.f32 0.032258064, %v284_v35 }
 0x165   : > { %657 = vrsqrt.f32 %v289_v36  ;;  %vm301_vm3 = vcmp.eq.f32.partialorder %v289_v36, inf  ;;  %v304_v49 = vand.u32 2147483648, %v289_v36  ;;  %vm308_vm4 = vcmp.eq.f32.partialorder %v290_v37, inf }
 0x166   : > { %659 = vrsqrt.f32 %v290_v37  ;;  %v287_v38 = vpop.xlane.xlu1 %286  ;;  %v311_v51 = vand.u32 2147483648, %v290_v37  ;;  %vm303_vm5 = vcmp.eq.f32.partialorder %v289_v36, 0.0  ;;  %vm310_vm6 = vcmp.eq.f32.partialorder %v290_v37, 0.0 }
 0x167   : > { %v291_v39 = vmul.f32 0.032258064, %v287_v38 }
 0x169   : > { %661 = vrsqrt.f32 %v291_v39  ;;  %vm315_vm7 = vcmp.eq.f32.partialorder %v291_v39, inf  ;;  %v318_v59 = vand.u32 2147483648, %v291_v39  ;;  %vm317_vm8 = vcmp.eq.f32.partialorder %v291_v39, 0.0 }
 0x16a   : > { %v410_v15 = vpop.permute.xlu1 %409 }
 0x16b   : > { %v656_v40 = vpop.eup %655 }
 0x16c   : > { %v293_v41 = vmul.f32 %v656_v40, %v288_v33 }
 0x16e   : > { %v295_v43 = vsel %vm294_vm1, %v288_v33, %v293_v41  ;;  %v414_v16 = vpop.permute.xlu1 %413 }
 0x16f   : > { %v658_v44 = vpop.eup %657  ;;  %v298_v45 = vsel %vm296_vm2, %v297_v42, %v295_v43 }
 0x170   : > { %v660_v46 = vpop.eup %659  ;;  %v300_v47 = vmul.f32 %v658_v44, %v289_v36  ;;  %v320_v48 = vadd.f32 1e-10, %v298_v45 }
 0x171   : > { %v307_v50 = vmul.f32 %v660_v46, %v290_v37 }
 0x172   : > { %663 = vrcp.f32 %v320_v48  ;;  %v302_v52 = vsel %vm301_vm3, %v289_v36, %v300_v47  ;;  %v418_v17 = vpop.permute.xlu1 %417 }
 0x173   : > { %v662_v53 = vpop.eup %661  ;;  %v305_v54 = vsel %vm303_vm5, %v304_v49, %v302_v52  ;;  %v309_v55 = vsel %vm308_vm4, %v290_v37, %v307_v50 }
 0x174   : > { %v314_v56 = vmul.f32 %v662_v53, %v291_v39  ;;  %v321_v57 = vadd.f32 1e-10, %v305_v54  ;;  %v312_v58 = vsel %vm310_vm6, %v311_v51, %v309_v55 }
 0x175   : > { %v322_v60 = vadd.f32 1e-10, %v312_v58 }
 0x176   : > { %665 = vrcp.f32 %v321_v57  ;;  %v316_v61 = vsel %vm315_vm7, %v291_v39, %v314_v56 }
 0x177   : > { %v319_v62 = vsel %vm317_vm8, %v318_v59, %v316_v61  ;;  %667 = vrcp.f32 %v322_v60 }
 0x178   : > { %v323_v63 = vadd.f32 1e-10, %v319_v62 }
 0x17a   : > { %669 = vrcp.f32 %v323_v63 }
 0x17c   : > { %v664_v1 = vpop.eup %663 }
 0x17d   : > { %v360_v2 = vmul.f32 %v664_v1, %v571_v0 }
 0x17f   : > { %366 = vperm.xlu0 %653, %v360_v2  }
 0x180   : > { %v666_v4 = vpop.eup %665 }
 0x181   : > { %v361_v5 = vmul.f32 %v666_v4, %v572_v3  ;;  %v668_v6 = vpop.eup %667 }
 0x182   : > { %v362_v8 = vmul.f32 %v668_v6, %v573_v7 }
 0x183   : > { %371 = vperm.xlu1 %654, %v361_v5  }
 0x184   : > { %v670_v9 = vpop.eup %669 }
 0x185   : > { %v363_v11 = vmul.f32 %v670_v9, %v574_v10 }
 0x187   : > { %376 = vperm.xlu1 %654, %v362_v8  }
 0x18b   : > { %381 = vperm.xlu1 %654, %v363_v11  }
 0x18f   : > { %421 = vperm.xlu1 %654, %v578_v14  }
 0x1fe   : > { %v367_v18 = vpop.permute.xlu0 %366 }
 0x1ff   : > { %v384_v19 = vmul.f32 %v367_v18, %v938_v12 }
 0x201   : > { %v424_v22 = vadd.f32 %v410_v15, %v384_v19 }
 0x202   : > { %v372_v23 = vpop.permute.xlu1 %371 }
 0x203   : > { %428 = vst.msk [vmem:[%s234_s6] sm:$0xff] %vm251_vm0, %v424_v22  ;;  %v385_v24 = vmul.f32 %v372_v23, %v946_v20 }
 0x205   : > { %v425_v25 = vadd.f32 %v414_v16, %v385_v24 }
 0x206   : > { %v377_v26 = vpop.permute.xlu1 %376 }
 0x207   : > { %429 = vst.msk [vmem:[%s234_s6 + $0x8] sm:$0xff] %vm251_vm0, %v425_v25  ;;  %v386_v27 = vmul.f32 %v377_v26, %v940_v13 }
 0x209   : > { %v426_v28 = vadd.f32 %v418_v17, %v386_v27 }
 0x20a   : > { %v382_v29 = vpop.permute.xlu1 %381 }
 0x20b   : > { %430 = vst.msk [vmem:[%s234_s6 + $0x10] sm:$0xff] %vm251_vm0, %v426_v28  ;;  %v387_v12 = vmul.f32 %v382_v29, %v948_v21 }
 0x20e   : > { %v422_v20 = vpop.permute.xlu1 %421 }
 0x20f   : > { %v427_v13 = vadd.f32 %v422_v20, %v387_v12 }
 0x211   : > { %431 = vst.msk [vmem:[%s234_s6 + $0x18] sm:$0xff] %vm251_vm0, %v427_v13 }
 0x212   : > { %714 = shalt.err (!%p711_p5)
}
 0x213   : > { %s715_s4 = scalar_lea.hbm %s997_s22, 512  ;;  %s719_s19 = scalar_lea.hbm %s1050_s3, 1024 }
 0x214   : > { %p716_p4 = scmp.ne.s32.totalorder %s997_s22, %s715_s4  ;;  %p720_p12 = scmp.lt.u32.totalorder %s997_s22, %s1050_s3 }
 0x215   : > { %p721_p1 = scmp.lt.u32.totalorder %s719_s19, %s715_s4  ;;  %p723_p8 = scmp.lt.u32.totalorder %s715_s4, %s997_s22 }
 0x216   : > { %p717_p7 = pnand %p716_p4, %p1058_p9 }
 0x217   : > { %p722_p3 = por %p721_p1, %p720_p12 }
 0x218   : > { %p718_p10 = pneg %p717_p7 }
 0x219   : > { %p724_p11 = por %p723_p8, %p722_p3 }
 0x21b   : > { %p725_p0 = pnand %p724_p11, %p718_p10 }
 0x21d   : > { %728 = shalt.err (!%p725_p0)
}
 0x21e   : > { %s790_s6 = smov 128   ;;  %s791_s9 = smov 8  }
 0x21f   : > { %588 = dma.vmem_to_hbm [thread:$0]  (%p1058_p9), %s991_s8, 512, %s997_s22, %s433_s23, %s790_s6, %s790_s6, %s791_s9  }
 0x220 PF: > { %s463_s18 = sand.u32 1, %s763_s12   ;;  %p1059_p6 = scmp.ne.s32.totalorder %s1055_s27, 0 }
 0x221   : > { %p1060_p13 = scmp.ge.s32.totalorder %s783_s17, 2  ;;  %s464_s10 = scalar_lea.sflag [#allocation4], %s463_s18 }
 0x223   : > { %p595_p2 = pnand %p1060_p13, %p1059_p6 }
 0x225   : > { %758 = dma.done.wait (!%p595_p2), %s464_s10, 512  }
 0x226   : > { %760 = vsyncadd (!%p595_p2), %s464_s10, 4294966784  ;;  %s19_s17 = sadd.s32 1, %s783_s17   ;;  %s1061_s12 = smov %s767_s13 }
 0x227   : > { %p16_p5 = scmp.ge.s32.totalorder %s19_s17, 4   ;;  %s1062_s13 = smov %s771_s14 }
 0x228   : > { %s1063_s14 = smov %s868_s26  ;;  %s1064_s15 = smov %s779_s16 }
 0x229   : > { %s1065_s16 = smov %s1067_s20  ;;  %18 = sbr.rel (!%p16_p5) target bundleno = 6 (0x6), region = 83 }
 0x230   :  { %469 = vsyncpa [#allocation3], 1 }
 0x231   :  { %471 = vsyncpa [#allocation3 + $0x1], 1 }
 0x232   :  { %472 = vsyncpa [#allocation4], 1 }
 0x233   :  { %474 = vsyncpa [#allocation4 + $0x1], 1 }

</bundles_post_ra>
